<compile_context>
chip_gen: v7x
topology: tpu7x:2x2x1
jax: 0.10.0
libtpu: 0.0.40
codegen_flags: <defaults>
</compile_context>

<pallas_src>
import functools
import math
from types import SimpleNamespace

import jax
import jax.numpy as jnp
from jax.experimental import pallas as pl
from jax.experimental.pallas import tpu as pltpu


# -----------------------------------------------------------------------------
# Generation-aware VMEM budget
# -----------------------------------------------------------------------------
def _vmem_limit_bytes():
    cap = None
    try:
        cap = getattr(pltpu.get_tpu_info(), "vmem_capacity_bytes", None)
    except Exception:
        cap = None
    if not cap:
        return 48 * 1024 * 1024                  # safe on every generation
    # 128 MiB physical (v5e/v6e) -> 96 MiB; 64 MiB physical (v7x) -> 48 MiB
    return int(min((cap * 3) // 4, 96 * 1024 * 1024))


_VMEM_LIMIT = _vmem_limit_bytes()


def _compiler_params(semantics):
    return pltpu.CompilerParams(dimension_semantics=semantics,
                                vmem_limit_bytes=_VMEM_LIMIT)


def _pick_tile(dim, preferred, align):
    """Largest tile <= preferred that divides `dim` and is a multiple of `align`;
    falls back to the full dim (full-extent blocks are always legal)."""
    if dim <= preferred:
        return dim
    t = (preferred // align) * align
    while t >= align:
        if dim % t == 0:
            return t
        t -= align
    return dim


# -----------------------------------------------------------------------------
# Fused T5 self-attention layer: x + O( softmax(Q K^T + bias) V ), Q/K/V of RMSNorm(x)
# Grid (B, H): B parallel (megacore), H streamed through a f32 accumulator.
# -----------------------------------------------------------------------------
def _attn_layer_kernel(x_ref, g_ref, wq_ref, wk_ref, wv_ref, *rest, eps, has_bias):
    if has_bias:
        bias_ref, wo_ref, o_ref, xn_ref, acc_ref = rest
    else:
        wo_ref, o_ref, xn_ref, acc_ref = rest
    h = pl.program_id(1)

    @pl.when(h == 0)
    def _():                                      # norm + residual init, once per batch row
        x = x_ref[0].astype(jnp.float32)
        var = jnp.mean(x * x, axis=-1, keepdims=True)
        xn_ref[...] = (g_ref[...] * x * jax.lax.rsqrt(var + eps)).astype(jnp.bfloat16)
        acc_ref[...] = x                          # attention residual (dropout p=0)

    xn = xn_ref[...]
    q = jnp.dot(xn, wq_ref[0], preferred_element_type=jnp.float32).astype(jnp.bfloat16)
    k = jnp.dot(xn, wk_ref[0], preferred_element_type=jnp.float32).astype(jnp.bfloat16)
    v = jnp.dot(xn, wv_ref[0], preferred_element_type=jnp.float32).astype(jnp.bfloat16)

    # T5 attention: no 1/sqrt(dk) scale; the (zero) extended attention mask is dropped.
    s = jax.lax.dot_general(q, k, (((1,), (1,)), ((), ())),
                            preferred_element_type=jnp.float32)          # (S, S)
    if has_bias:
        s = s + bias_ref[0]
    s = s - jnp.max(s, axis=-1, keepdims=True)
    p = jnp.exp(s)
    p = p * pl.reciprocal(jnp.sum(p, axis=-1, keepdims=True), approx=True)

    ctx = jnp.dot(p.astype(jnp.bfloat16), v, preferred_element_type=jnp.float32)  # (S, dk)
    # o-projection fused here: sum over heads of ctx_h @ Wo_h, accumulated in f32
    acc_ref[...] += jnp.dot(ctx.astype(jnp.bfloat16), wo_ref[0],
                            preferred_element_type=jnp.float32)

    @pl.when(h == pl.num_programs(1) - 1)
    def _():
        o_ref[0] = acc_ref[...].astype(o_ref.dtype)


def pallas_attention_layer(x, gamma, wq, wk, wv, wo, bias, eps):
    """x:(B,S,D) bf16; wq/wk/wv:(H,D,dk) bf16; wo:(H,dk,D) bf16; bias:(H,S,S) f32 or None."""
    B, S, D = x.shape
    H, _, dk = wq.shape
    has_bias = bias is not None

    in_specs = [pl.BlockSpec((1, S, D), lambda b, h: (b, 0, 0)),
                pl.BlockSpec((1, D), lambda b, h: (0, 0)),
                pl.BlockSpec((1, D, dk), lambda b, h: (h, 0, 0)),
                pl.BlockSpec((1, D, dk), lambda b, h: (h, 0, 0)),
                pl.BlockSpec((1, D, dk), lambda b, h: (h, 0, 0))]
    args = [x, gamma.reshape(1, D), wq, wk, wv]
    if has_bias:
        in_specs.append(pl.BlockSpec((1, S, S), lambda b, h: (h, 0, 0)))   # per-head bias
        args.append(bias)
    in_specs.append(pl.BlockSpec((1, dk, D), lambda b, h: (h, 0, 0)))
    args.append(wo)

    # TODO(synk): flash-style S tiling (grid (B,H,Sq,Skv) + online softmax) for long S.
    return pl.pallas_call(
        functools.partial(_attn_layer_kernel, eps=eps, has_bias=has_bias),
        out_shape=jax.ShapeDtypeStruct((B, S, D), jnp.bfloat16),
        grid=(B, H),
        in_specs=in_specs,
        out_specs=pl.BlockSpec((1, S, D), lambda b, h: (b, 0, 0)),
        scratch_shapes=[pltpu.VMEM((S, D), jnp.bfloat16),     # normed activations
                        pltpu.VMEM((S, D), jnp.float32)],     # residual + o-proj accumulator
        compiler_params=_compiler_params(("parallel", "arbitrary")),
    )(*args)


# -----------------------------------------------------------------------------
# Fused T5 FF layer: x + wo(relu(wi(RMSNorm(x)))), d_ff streamed; optional fused
# side-downsample (+ side residual) epilogue.
# -----------------------------------------------------------------------------
def _ffn_kernel(x_ref, g_ref, wi_ref, wo_ref, *rest, eps, has_side):
    if has_side:
        wd_ref, sres_ref, o_ref, so_ref, xn_ref, acc_ref = rest
    else:
        o_ref, xn_ref, acc_ref = rest
    f = pl.program_id(1)

    @pl.when(f == 0)
    def _():
        x = x_ref[...].astype(jnp.float32)
        var = jnp.mean(x * x, axis=-1, keepdims=True)
        xn_ref[...] = (g_ref[...] * x * jax.lax.rsqrt(var + eps)).astype(jnp.bfloat16)
        acc_ref[...] = x                                     # FFN residual (dropout p=0)

    hmid = jnp.dot(xn_ref[...], wi_ref[...], preferred_element_type=jnp.float32)
    hmid = jnp.maximum(hmid, 0.0)                            # ReLU (T5 DenseReluDense)
    acc_ref[...] += jnp.dot(hmid.astype(jnp.bfloat16), wo_ref[...],
                            preferred_element_type=jnp.float32)

    @pl.when(f == pl.num_programs(1) - 1)
    def _():
        out = acc_ref[...]
        o_ref[...] = out.astype(o_ref.dtype)
        if has_side:     # side_hidden + (block output @ W_down), fused in the epilogue
            so_ref[...] = (sres_ref[...].astype(jnp.float32)
                           + jnp.dot(out.astype(jnp.bfloat16), wd_ref[...],
                                     preferred_element_type=jnp.float32)
                           ).astype(so_ref.dtype)


def pallas_ffn(x, gamma, wi, wo, eps, w_down=None, side_res=None, *, tm=512, tf=1024):
    M, D = x.shape
    _, F = wi.shape
    has_side = w_down is not None
    btm = _pick_tile(M, tm, 16)
    btf = _pick_tile(F, tf, 128)

    in_specs = [pl.BlockSpec((btm, D), lambda i, f: (i, 0)),
                pl.BlockSpec((1, D), lambda i, f: (0, 0)),
                pl.BlockSpec((D, btf), lambda i, f: (0, f)),
                pl.BlockSpec((btf, D), lambda i, f: (f, 0))]
    args = [x, gamma.reshape(1, D), wi, wo]
    if has_side:
        Ds = w_down.shape[1]
        in_specs += [pl.BlockSpec((D, Ds), lambda i, f: (0, 0)),
                     pl.BlockSpec((btm, Ds), lambda i, f: (i, 0))]
        args += [w_down, side_res]
        out_shape = (jax.ShapeDtypeStruct((M, D), jnp.bfloat16),
                     jax.ShapeDtypeStruct((M, Ds), jnp.bfloat16))
        out_specs = (pl.BlockSpec((btm, D), lambda i, f: (i, 0)),
                     pl.BlockSpec((btm, Ds), lambda i, f: (i, 0)))
    else:
        out_shape = jax.ShapeDtypeStruct((M, D), jnp.bfloat16)
        out_specs = pl.BlockSpec((btm, D), lambda i, f: (i, 0))

    return pl.pallas_call(
        functools.partial(_ffn_kernel, eps=eps, has_side=has_side),
        out_shape=out_shape,
        grid=(M // btm, F // btf),
        in_specs=in_specs,
        out_specs=out_specs,
        scratch_shapes=[pltpu.VMEM((btm, D), jnp.bfloat16),   # normed activations
                        pltpu.VMEM((btm, D), jnp.float32)],   # residual + wo accumulator
        compiler_params=_compiler_params(("parallel", "arbitrary")),
    )(*args)


# -----------------------------------------------------------------------------
# Plain matmul (only used for side_first_downsample), bf16 MXU operands
# -----------------------------------------------------------------------------
def _matmul_kernel(x_ref, w_ref, o_ref):
    o_ref[...] = jnp.dot(x_ref[...], w_ref[...],
                         preferred_element_type=jnp.float32).astype(o_ref.dtype)


def pallas_matmul(x, w, *, tm=512, tn=512):
    M, K = x.shape
    _, N = w.shape
    btm = _pick_tile(M, tm, 16)
    btn = _pick_tile(N, tn, 128)
    return pl.pallas_call(
        _matmul_kernel,
        out_shape=jax.ShapeDtypeStruct((M, N), jnp.bfloat16),
        grid=(M // btm, N // btn),
        in_specs=[pl.BlockSpec((btm, K), lambda i, j: (i, 0)),
                  pl.BlockSpec((K, btn), lambda i, j: (0, j))],
        out_specs=pl.BlockSpec((btm, btn), lambda i, j: (i, j)),
        compiler_params=_compiler_params(("parallel", "parallel")),
    )(x, w)


# -----------------------------------------------------------------------------
# Standalone T5 RMS LayerNorm — only the two final layer norms (f32 outputs)
# -----------------------------------------------------------------------------
def _rmsnorm_kernel(x_ref, g_ref, o_ref, *, eps):
    x = x_ref[...].astype(jnp.float32)
    var = jnp.mean(x * x, axis=-1, keepdims=True)
    o_ref[...] = (g_ref[...] * x * jax.lax.rsqrt(var + eps)).astype(o_ref.dtype)


def pallas_rmsnorm(x3, gamma, eps, *, tm=1024):
    B, S, D = x3.shape
    M = B * S
    btm = _pick_tile(M, tm, 16)
    y = pl.pallas_call(
        functools.partial(_rmsnorm_kernel, eps=eps),
        out_shape=jax.ShapeDtypeStruct((M, D), jnp.float32),
        grid=(M // btm,),
        in_specs=[pl.BlockSpec((btm, D), lambda i: (i, 0)),
                  pl.BlockSpec((1, D), lambda i: (0, 0))],
        out_specs=pl.BlockSpec((btm, D), lambda i: (i, 0)),
        compiler_params=_compiler_params(("parallel",)),
    )(x3.reshape(M, D), gamma.reshape(1, D))
    return y.reshape(B, S, D)


# -----------------------------------------------------------------------------
# Relative position bias (glue: bucketing + gather in plain JAX)
# -----------------------------------------------------------------------------
def relative_position_bucket(relative_position, bidirectional, num_buckets, max_distance):
    relative_buckets = jnp.zeros_like(relative_position)
    if bidirectional:
        num_buckets //= 2
        relative_buckets = relative_buckets + (relative_position > 0).astype(jnp.int32) * num_buckets
        relative_position = jnp.abs(relative_position)
    else:
        relative_position = -jnp.minimum(relative_position, 0)
    max_exact = num_buckets // 2
    is_small = relative_position < max_exact
    rel_pos_f = jnp.maximum(relative_position, 1).astype(jnp.float32)
    rel_pos_if_large = max_exact + (
        jnp.log(rel_pos_f / max_exact) / math.log(max_distance / max_exact)
        * (num_buckets - max_exact)
    ).astype(jnp.int32)
    rel_pos_if_large = jnp.minimum(rel_pos_if_large, num_buckets - 1)
    return relative_buckets + jnp.where(is_small, relative_position, rel_pos_if_large)


def compute_bias(rel_weight, q_len, k_len, num_buckets, max_distance, bidirectional=True):
    ctx = jnp.arange(q_len, dtype=jnp.int32)[:, None]
    mem = jnp.arange(k_len, dtype=jnp.int32)[None, :]
    buckets = relative_position_bucket(mem - ctx, bidirectional, num_buckets, max_distance)
    values = rel_weight[buckets]                                 # (q, k, H) gather (glue)
    return jnp.transpose(values, (2, 0, 1)).astype(jnp.float32)  # (H, q, k)


# -----------------------------------------------------------------------------
# T5 blocks / stack
# -----------------------------------------------------------------------------
def t5_block_forward(hidden, p, bias, eps, w_down=None, side_res=None):
    """T5Block (encoder) = fused self-attention layer + fused FF layer.
    If w_down is given, the following side-downsample + side residual is fused
    into the FFN epilogue and both (hidden, side_pre) are returned."""
    B, S, D = hidden.shape
    attn = pallas_attention_layer(hidden, p["ln0"], p["wq"], p["wk"], p["wv"],
                                  p["wo"], bias, eps)
    side2 = None if side_res is None else side_res.reshape(B * S, -1)
    out = pallas_ffn(attn.reshape(B * S, D), p["ln1"], p["wi"], p["wo_ff"], eps,
                     w_down=w_down, side_res=side2)
    if w_down is None:
        return out.reshape(B, S, D)
    h, s = out
    return h.reshape(B, S, D), s.reshape(B, S, -1)


def t5_side_pp_stack_forward(input_ids, params, cfg):
    """T5SidePPStack.forward (encoder, is_encoder_first & is_encoder_last True)."""
    B, S = input_ids.shape
    M = B * S
    eps = cfg.layer_norm_epsilon
    hidden = params["shared"][input_ids]                       # embedding gather (glue), bf16
    # attention_mask = ones -> extended attention mask is identically zero: dropped.

    side_hidden = pallas_matmul(hidden.reshape(M, cfg.d_model),
                                params["side_first_downsample"]
                                ).reshape(B, S, cfg.side_d_model)

    # T5SidePPStack always passes position_bias=None, so only layer 0
    # (has_relative_attention_bias=True) contributes a non-zero bias.
    main_bias = compute_bias(params["block"][0]["rel_bias"], S, S,
                             cfg.relative_attention_num_buckets,
                             cfg.relative_attention_max_distance)
    side_bias = compute_bias(params["side_block"][0]["rel_bias"], S, S,
                             cfg.relative_attention_num_buckets,
                             cfg.relative_attention_max_distance)

    for i in range(cfg.num_layers):
        # main block; side residual + downsample projection fused into its FFN epilogue
        hidden, side_pre = t5_block_forward(
            hidden, params["block"][i], main_bias if i == 0 else None, eps,
            w_down=params["side_downsamples"][i], side_res=side_hidden)
        # side block
        side_hidden = t5_block_forward(
            side_pre, params["side_block"][i], side_bias if i == 0 else None, eps)

    # is_encoder_last: final layer norms (dropout p=0 = identity), f32 outputs
    hidden = pallas_rmsnorm(hidden, params["final_layer_norm"], eps)
    side_hidden = pallas_rmsnorm(side_hidden, params["final_side_layer_norm"], eps)
    return hidden, side_hidden


def t5_side_pp_model_forward(input_ids, params, cfg):
    """T5SidePPModel.forward, encoder configuration (is_encoder & is_encoder_first)."""
    encoder_outputs, side_encoder_outputs = t5_side_pp_stack_forward(input_ids, params, cfg)
    return encoder_outputs, side_encoder_outputs


# -----------------------------------------------------------------------------
# Deterministic parameter initialization (synthetic, matches module shapes)
# Weights stored bf16 (MXU operands), layer-norm gammas / rel-bias tables f32.
# -----------------------------------------------------------------------------
def _normal(key, shape, scale=0.05, dtype=jnp.bfloat16):
    return (jax.random.normal(key, shape, dtype=jnp.float32) * scale).astype(dtype)


def init_block_params(key, d_model, d_kv, d_ff, n_heads, has_rel_bias, num_buckets):
    keys = jax.random.split(key, 7)
    p = {
        "ln0": jnp.ones((d_model,), jnp.float32),
        "wq": _normal(keys[0], (n_heads, d_model, d_kv)),     # per-head layout (H, D, dk)
        "wk": _normal(keys[1], (n_heads, d_model, d_kv)),
        "wv": _normal(keys[2], (n_heads, d_model, d_kv)),
        "wo": _normal(keys[3], (n_heads, d_kv, d_model)),     # per-head layout (H, dk, D)
        "ln1": jnp.ones((d_model,), jnp.float32),
        "wi": _normal(keys[4], (d_model, d_ff)),
        "wo_ff": _normal(keys[5], (d_ff, d_model)),
    }
    if has_rel_bias:
        p["rel_bias"] = _normal(keys[6], (num_buckets, n_heads), dtype=jnp.float32)
    return p


def init_params(key, cfg):
    keys = jax.random.split(key, 4 + 3 * cfg.num_layers)
    params = {
        "shared": _normal(keys[0], (cfg.vocab_size, cfg.d_model)),
        "side_first_downsample": _normal(keys[1], (cfg.d_model, cfg.side_d_model)),
        "final_layer_norm": jnp.ones((cfg.d_model,), jnp.float32),
        "final_side_layer_norm": jnp.ones((cfg.side_d_model,), jnp.float32),
        "block": [],
        "side_block": [],
        "side_downsamples": [],
    }
    for i in range(cfg.num_layers):
        params["block"].append(
            init_block_params(keys[2 + 3 * i], cfg.d_model, cfg.d_kv, cfg.d_ff,
                              cfg.num_heads, i == 0, cfg.relative_attention_num_buckets))
        params["side_block"].append(
            init_block_params(keys[3 + 3 * i], cfg.side_d_model, cfg.side_d_kv, cfg.side_d_ff,
                              cfg.num_heads, i == 0, cfg.relative_attention_num_buckets))
        params["side_downsamples"].append(
            _normal(keys[4 + 3 * i], (cfg.d_model, cfg.side_d_model)))
    return params


# -----------------------------------------------------------------------------
if __name__ == "__main__":
    # Config: encoder-only pipeline stage that is both first and last.
    # add_bias_sampling=False (no bias on sampling Linears), dropout_rate=0.0.
    cfg = SimpleNamespace(
        vocab_size=100,
        d_model=32,
        d_kv=8,
        d_ff=64,
        num_heads=4,
        num_layers=2,                       # num_pp_encoder_layers
        side_reduction_factor=2,
        layer_norm_epsilon=1e-6,
        relative_attention_num_buckets=32,
        relative_attention_max_distance=128,
    )
    cfg.side_d_model = cfg.d_model // cfg.side_reduction_factor   # 16
    cfg.side_d_kv = cfg.d_kv // cfg.side_reduction_factor         # 4
    cfg.side_d_ff = cfg.d_ff // cfg.side_reduction_factor         # 32

    key = jax.random.PRNGKey(0)
    pkey, ikey = jax.random.split(key)
    params = init_params(pkey, cfg)

    batch, seq = 2, 8
    input_ids = jax.random.randint(ikey, (batch, seq), 0, cfg.vocab_size, dtype=jnp.int32)

    hidden, side_hidden = t5_side_pp_model_forward(input_ids, params, cfg)
    jax.block_until_ready((hidden, side_hidden))

    assert hidden.shape == (batch, seq, cfg.d_model)
    assert side_hidden.shape == (batch, seq, cfg.side_d_model)
    assert hidden.dtype == jnp.float32 and side_hidden.dtype == jnp.float32
    print("KERNEL_OK")
</pallas_src>

<mosaic_0001>
module attributes {stable_mosaic.version = 11 : i64} {
  func.func @_matmul_kernel(%arg0: i32, %arg1: i32, %arg2: memref<16x32xbf16, #tpu.memory_space<vmem>>, %arg3: memref<32x16xbf16, #tpu.memory_space<vmem>>, %arg4: memref<16x16xbf16, #tpu.memory_space<vmem>>) attributes {dimension_semantics = [#tpu.dimension_semantics<parallel>, #tpu.dimension_semantics<parallel>], iteration_bounds = array<i64: 1, 1>, scalar_prefetch = 0 : i64, scratch_operands = 0 : i64, tpu.core_type = #tpu.core_type<tc>, window_params = [{transform_indices = @transform_0, window_bounds = array<i64: 16, 32>}, {transform_indices = @transform_1, window_bounds = array<i64: 32, 16>}, {transform_indices = @transform_2, window_bounds = array<i64: 16, 16>}]} {
    %c0 = arith.constant 0 : index
    %c0_0 = arith.constant 0 : index
    %0 = vector.load %arg2[%c0, %c0_0] : memref<16x32xbf16, #tpu.memory_space<vmem>>, vector<16x32xbf16>
    %c0_1 = arith.constant 0 : index
    %c0_2 = arith.constant 0 : index
    %1 = vector.load %arg3[%c0_1, %c0_2] : memref<32x16xbf16, #tpu.memory_space<vmem>>, vector<32x16xbf16>
    %cst = arith.constant dense<0.000000e+00> : vector<16x16xf32>
    %2 = tpu.matmul %0, %1, %cst {dimension_numbers = #tpu.dot_dimension_numbers<[1], [0], [0], [1], [0, 0, 1, 1], [], []>} : vector<16x32xbf16>, vector<32x16xbf16>, vector<16x16xf32> -> vector<16x16xf32>
    %3 = arith.truncf %2 : vector<16x16xf32> to vector<16x16xbf16>
    %c0_3 = arith.constant 0 : index
    %c0_4 = arith.constant 0 : index
    %4 = vector.load %arg4[%c0_3, %c0_4] : memref<16x16xbf16, #tpu.memory_space<vmem>>, vector<16x16xbf16>
    tpu.vector_store %arg4[%c0_3, %c0_4], %3 {strides = array<i32>} : memref<16x16xbf16, #tpu.memory_space<vmem>>, vector<16x16xbf16>,
    return
  }
  func.func @transform_0(%arg0: i32, %arg1: i32) -> (i32, i32) {
    %c0_i32 = arith.constant 0 : i32
    %c0_i32_0 = arith.constant 0 : i32
    return %arg0, %c0_i32 : i32, i32
  }
  func.func @transform_1(%arg0: i32, %arg1: i32) -> (i32, i32) {
    %c0_i32 = arith.constant 0 : i32
    %c0_i32_0 = arith.constant 0 : i32
    return %c0_i32, %arg1 : i32, i32
  }
  func.func @transform_2(%arg0: i32, %arg1: i32) -> (i32, i32) {
    %c0_i32 = arith.constant 0 : i32
    return %arg0, %arg1 : i32, i32
  }
}

</mosaic_0001>

<bundles_post_ra>
// kernel: tpu_custom_call.1
= control target key start
LH: loop header
LB: loop body
LE: loop exit
PB: predicated region body
PF: predicated region fallthrough
CT: control target
= control target key end

     0   :  { %v159_v1 = vmov 0.0   ;;  %vm160_vm0 = vmmov 0   ;;  %s200_s0 = inlined_call_operand.vmem [shape: bf16[16,32], index: 0, kind: input, shape index: {}]   ;;  %s201_s1 = inlined_call_operand.vmem [shape: bf16[32,16], index: 1, kind: input, shape index: {}]   ;;  %s202_s2 = inlined_call_operand.hbm [shape: bf16[16,16], index: 2, kind: output, shape index: {}]  }
   0x1   :  { %v132_v0 = vld [vmem:[%s201_s1] sm:$0xff]   ;;  %119 = vmatprep.subr.bf16.mxu0 %v159_v1  ;;  %v133_v2 = vld [vmem:[%s201_s1 + $0x8] sm:$0xff]   ;;  %123 = vmatprep.mubr.msk.bf16.mxu0 %vm160_vm0, %v159_v1 }
   0x2   :  { %120 = vmatpush3.bf16.msra.mxu0 %v132_v0 }
   0x3   :  { %121 = vmatprep.subr.bf16.mxu0 %v159_v1 }
   0x4   :  { %7 = vsyncpa [#allocation3], 0  ;;  %v134_v3 = vld [vmem:[%s200_s0] sm:$0xff]   ;;  %vm36_vm1 = vcmask 261120   ;;  %s161_s15 = smov [#allocation2]   ;;  %vm89_vm2 = vcmask 125952  }
   0x5   :  { %s97_s16 = sshll.u32 %s161_s15, 4  ;;  %s98_s16 = int_to_ptr.vmem [resolvable:$true] %s97_s16 }
   0x6   :  { %122 = vmatpush3.bf16.msra.mxu0 %v133_v2  ;;  %s135_s1 = scalar_lea.vmem %s98_s16, 128  ;;  %p140_p1 = scmp.lt.s32.totalorder %s98_s16, %s98_s16 }
   0x7   :  { %p136_p0 = scmp.ne.s32.totalorder %s98_s16, %s135_s1  ;;  %p141_p2 = scmp.lt.s32.totalorder %s135_s1, %s135_s1 }
   0x9   :  { %124 = vmatmul.mubr.msk.bf16.vlgmr.msra.gmra.mrb[0].mxu0 %vm36_vm1, %v134_v3  ;;  %p142_p3 = por %p141_p2, %p140_p1 }
   0xb   :  { %p143_p4 = pnand %p142_p3, %p136_p0 }
  0xdc   :  { %v74_v4 = vpop.f32.mrb[0].mxu0 }
  0xdd   :  { %v114_v5 = vpack.c.bf16 %v74_v4, %v74_v4  ;;  %v125_v6 = vpop.f32.mrb[1].mxu0 }
  0xde   :  { %v77_v7 = vpop.f32.mrb[2].mxu0 }
  0xdf   :  { %90 = vst.msk [vmem:[#allocation2] sm:$0xf] %vm89_vm2, %v114_v5  ;;  %v115_v8 = vpack.c.bf16 %v77_v7, %v77_v7  ;;  %v126_v9 = vpop.f32.mrb[3].mxu0 }
  0xe1   :  { %91 = vst.msk [vmem:[#allocation2 + $0x4] sm:$0xf] %vm89_vm2, %v115_v8 }
  0xe2   :  { %146 = shalt.err (!%p143_p4)
}
  0xe3   :  { %s147_s18 = scalar_lea.hbm %s202_s2, 128 }
  0xe4   :  { %p148_p5 = scmp.ne.s32.totalorder %s202_s2, %s147_s18  ;;  %p151_p6 = scmp.lt.u32.totalorder %s147_s18, %s202_s2 }
  0xe6   :  { %p153_p7 = pnand %p151_p6, %p148_p5 }
  0xe8   :  { %156 = shalt.err (!%p153_p7)
}
  0xe9   :  { %s162_s23 = smov 64   ;;  %s163_s24 = smov 4  }
  0xea   :  { %103 = dma.vmem_to_hbm [thread:$0]  %s98_s16, 128, %s202_s2, [#allocation3], %s162_s23, %s162_s23, %s163_s24  }
  0xeb   :  { %157 = dma.done.wait [#allocation3], 128  }
  0xec   :  { %158 = vsyncadd [#allocation3], 4294967168 }
  0xed   :  { %107 = vsyncpa [#allocation3], 1 }

</bundles_post_ra>
